<compile_context>
chip_gen: v6e
topology: v6e:2x2x1
jax: 0.10.0
libtpu: 0.0.40
codegen_flags: <defaults>
</compile_context>

<pallas_src>
import jax
import jax.numpy as jnp
from jax.experimental import pallas as pl
from jax.experimental.pallas import tpu as pltpu


def _round_up(x, m):
    return (x + m - 1) // m * m


def _linear_kernel(x_ref, w_ref, b_ref, o_ref):
    # x_ref: (TM, H), w_ref: (H, C) [pre-transposed], b_ref: (1, C), o_ref: (TM, C)
    acc = jnp.dot(x_ref[...], w_ref[...], preferred_element_type=jnp.float32)
    acc = acc + b_ref[...].astype(jnp.float32)  # broadcast bias over rows
    o_ref[...] = acc.astype(o_ref.dtype)


def pooler_start_logits(hidden_states, weight, bias, p_mask=None, *, tm=1024):
    """hidden_states: (B, S, H); weight: (C, H) [PyTorch layout]; bias: (C,).

    Returns logits of shape (B, S, C).  p_mask is unused — the reference
    module's forward ignores it.
    """
    B, S, H = hidden_states.shape
    C = weight.shape[0]
    M = B * S

    x2d = hidden_states.reshape(M, H)
    w_t = weight.T                      # (H, C): one-time, tiny, MXU-native layout
    b2d = bias.reshape(1, C)

    itemsize = jnp.dtype(hidden_states.dtype).itemsize
    row_mult = 16 if hidden_states.dtype == jnp.bfloat16 else 8

    # Adaptive row tile.
    #  - tm_vmem: keep the double-buffered x tiles within a conservative 24 MiB
    #    budget (valid on v5e/v6e 128 MiB and v7x 64 MiB per-TC VMEM).
    #  - tm_2step: never use fewer than 2 grid steps, so both v7x TCs get work.
    x_budget_bytes = 24 * 1024 * 1024
    tm_vmem = max(row_mult, (x_budget_bytes // (2 * H * itemsize)) // row_mult * row_mult)
    tm_2step = _round_up(pl.cdiv(M, 2), row_mult)
    TM = min(tm, tm_vmem, tm_2step, _round_up(M, row_mult))
    TM = max(row_mult, (TM // row_mult) * row_mult)

    grid = (pl.cdiv(M, TM),)

    # Explicit scoped-VMEM limit sized from the real footprint (+ slack), so the
    # chosen TM compiles on every generation without being silently capped.
    vmem_bytes = (2 * TM * H * itemsize      # double-buffered x tiles
                  + 2 * C * H * itemsize     # weight (counted double-buffered, tiny)
                  + 2 * C * itemsize         # bias
                  + 2 * TM * C * itemsize    # double-buffered out tiles
                  + (2 << 20))               # slack
    vmem_limit = int(min(vmem_bytes, 48 * 1024 * 1024))

    cost = pl.CostEstimate(
        flops=2 * M * H * C,
        transcendentals=0,
        bytes_accessed=(M * H + C * H + M * C) * itemsize,
    )

    out = pl.pallas_call(
        _linear_kernel,
        out_shape=jax.ShapeDtypeStruct((M, C), hidden_states.dtype),
        grid_spec=pltpu.PrefetchScalarGridSpec(
            num_scalar_prefetch=0,
            grid=grid,
            in_specs=[
                pl.BlockSpec((TM, H), lambda i: (i, 0)),   # streamed x tiles
                pl.BlockSpec((H, C), lambda i: (0, 0)),    # resident weight (H, C)
                pl.BlockSpec((1, C), lambda i: (0, 0)),    # resident bias
            ],
            out_specs=pl.BlockSpec((TM, C), lambda i: (i, 0)),
        ),
        compiler_params=pltpu.CompilerParams(
            # TODO(synk): on v7x, verify "parallel" shards the row stream across
            # both TensorCores; switch to pltpu.CORE_PARALLEL if it does not.
            dimension_semantics=("parallel",),
            vmem_limit_bytes=vmem_limit,
        ),
        cost_estimate=cost,
    )(x2d, w_t, b2d)

    return out.reshape(B, S, C)


if __name__ == "__main__":
    # Small shapes implied by the module: (batch, seq, hidden) -> (batch, seq, num_classes)
    batch, seq, hidden, num_classes = 2, 8, 32, 4

    key = jax.random.PRNGKey(0)
    k_x, k_w, k_b = jax.random.split(key, 3)

    hidden_states = jax.random.normal(k_x, (batch, seq, hidden), dtype=jnp.float32)
    # Deterministic parameter init (synthetic, nn.Linear-like scale).
    bound = 1.0 / (hidden ** 0.5)
    weight = jax.random.uniform(k_w, (num_classes, hidden), dtype=jnp.float32,
                                minval=-bound, maxval=bound)
    bias = jax.random.uniform(k_b, (num_classes,), dtype=jnp.float32,
                              minval=-bound, maxval=bound)

    out = pooler_start_logits(hidden_states, weight, bias)
    out = jax.block_until_ready(out)

    # Cross-check against plain JAX reference.
    ref = hidden_states @ weight.T + bias
    assert out.shape == (batch, seq, num_classes)
    assert jnp.allclose(out, ref, atol=1e-5, rtol=1e-5)

    print("KERNEL_OK")
</pallas_src>

<mosaic_0001>
module attributes {stable_mosaic.version = 11 : i64} {
  func.func @_linear_kernel(%arg0: i32, %arg1: memref<8x32xf32, #tpu.memory_space<vmem>>, %arg2: memref<32x4xf32, #tpu.memory_space<vmem>>, %arg3: memref<1x4xf32, #tpu.memory_space<vmem>>, %arg4: memref<8x4xf32, #tpu.memory_space<vmem>>) attributes {dimension_semantics = [#tpu.dimension_semantics<parallel>], iteration_bounds = array<i64: 2>, scalar_prefetch = 0 : i64, scratch_operands = 0 : i64, tpu.core_type = #tpu.core_type<tc>, window_params = [{transform_indices = @transform_0, window_bounds = array<i64: 8, 32>}, {pipeline_mode = #tpu.pipeline_mode<synchronous>, transform_indices = @transform_1, window_bounds = array<i64: 32, 4>}, {pipeline_mode = #tpu.pipeline_mode<synchronous>, transform_indices = @transform_2, window_bounds = array<i64: 1, 4>}, {transform_indices = @transform_3, window_bounds = array<i64: 8, 4>}]} {
    %c0 = arith.constant 0 : index
    %c0_0 = arith.constant 0 : index
    %0 = vector.load %arg1[%c0, %c0_0] : memref<8x32xf32, #tpu.memory_space<vmem>>, vector<8x32xf32>
    %c0_1 = arith.constant 0 : index
    %c0_2 = arith.constant 0 : index
    %1 = vector.load %arg2[%c0_1, %c0_2] : memref<32x4xf32, #tpu.memory_space<vmem>>, vector<32x4xf32>
    %cst = arith.constant dense<0.000000e+00> : vector<8x4xf32>
    %2 = tpu.matmul %0, %1, %cst {dimension_numbers = #tpu.dot_dimension_numbers<[1], [0], [0], [1], [0, 0, 1, 1], [], []>} : vector<8x32xf32>, vector<32x4xf32>, vector<8x4xf32> -> vector<8x4xf32>
    %c0_3 = arith.constant 0 : index
    %c0_4 = arith.constant 0 : index
    %3 = vector.load %arg3[%c0_3, %c0_4] : memref<1x4xf32, #tpu.memory_space<vmem>>, vector<1x4xf32>
    %4 = vector.broadcast %3 : vector<1x4xf32> to vector<8x4xf32>
    %5 = arith.addf %2, %4 : vector<8x4xf32>
    %c0_5 = arith.constant 0 : index
    %c0_6 = arith.constant 0 : index
    %6 = vector.load %arg4[%c0_5, %c0_6] : memref<8x4xf32, #tpu.memory_space<vmem>>, vector<8x4xf32>
    tpu.vector_store %arg4[%c0_5, %c0_6], %5 {strides = array<i32>} : memref<8x4xf32, #tpu.memory_space<vmem>>, vector<8x4xf32>,
    return
  }
  func.func @transform_0(%arg0: i32) -> (i32, i32) {
    %c0_i32 = arith.constant 0 : i32
    %c0_i32_0 = arith.constant 0 : i32
    return %arg0, %c0_i32 : i32, i32
  }
  func.func @transform_1(%arg0: i32) -> (i32, i32) {
    %c0_i32 = arith.constant 0 : i32
    %c0_i32_0 = arith.constant 0 : i32
    %c0_i32_1 = arith.constant 0 : i32
    return %c0_i32, %c0_i32_0 : i32, i32
  }
  func.func @transform_2(%arg0: i32) -> (i32, i32) {
    %c0_i32 = arith.constant 0 : i32
    %c0_i32_0 = arith.constant 0 : i32
    %c0_i32_1 = arith.constant 0 : i32
    return %c0_i32, %c0_i32_0 : i32, i32
  }
  func.func @transform_3(%arg0: i32) -> (i32, i32) {
    %c0_i32 = arith.constant 0 : i32
    %c0_i32_0 = arith.constant 0 : i32
    return %arg0, %c0_i32 : i32, i32
  }
}

</mosaic_0001>

<bundles_post_ra>
// kernel: tpu_custom_call.1
= control target key start
LH: loop header
LB: loop body
LE: loop exit
PB: predicated region body
PF: predicated region fallthrough
CT: control target
= control target key end

     0   :  { %s374_s12 = smov 0   ;;  %s406_s0 = inlined_call_operand.vmem [shape: f32[16,32], index: 0, kind: input, shape index: {}]   ;;  %s407_s1 = inlined_call_operand.vmem [shape: f32[32,4], index: 1, kind: input, shape index: {}]   ;;  %s408_s2 = inlined_call_operand.vmem [shape: f32[1,4], index: 2, kind: input, shape index: {}]   ;;  %s409_s3 = inlined_call_operand.vmem [shape: f32[16,4], index: 3, kind: output, shape index: {}]  }
   0x1 LB: > { %s307_s13 = sadd.s32 4294967295, %s350_s12   ;;  %p311_p0 = scmp.ge.s32.totalorder %s350_s12, 1  ;;  %s350_s12 = sphi %s374_s12, %s13_s12  }
   0x2   : > { %p136_p1 = scmp.lt.s32.totalorder %s350_s12, 3 }
   0x4   : > { %p137_p2 = pnand %p311_p0, %p136_p1 }
   0x5   : > { %p158_p3 = scmp.lt.s32.totalorder (!%p137_p2), %s307_s13, 1 }
   0x6   : > { %140 = sbr.rel (%p137_p2) target bundleno = 216 (0xd8), region = 32 }
   0xb   : > { %v170_v0 = vld [vmem:[%s407_s1 + $0x18] sm:$0xff]  ;;  %v352_v1 = vmov 0.0   ;;  %v169_v2 = vld [vmem:[%s407_s1 + $0x10] sm:$0xff]  ;;  %vm353_vm0 = vmmov 0   ;;  %s411_s13 = smov (!%p158_p3, %s307_s13), 1  ;;  %v168_v3 = vld [vmem:[%s407_s1 + $0x8] sm:$0xff] }
   0xc   : > { %323 = vmatprep.subr.mxu0 %v352_v1  ;;  %331 = vmatprep.mubr.msk.f32.mxu0 %vm353_vm0, %v352_v1  ;;  %s312_s20 = sshll.u32 %s411_s13, 3  ;;  %v167_v4 = vld [vmem:[%s407_s1] sm:$0xff]  ;;  %vm178_vm1 = vcmask 261120   ;;  %vm252_vm2 = vcmask 31744  }
   0xd   : > { %324 = vmatpush3.msra.mxu0 %v170_v0  ;;  %s161_s25 = scalar_lea.vmem %s406_s0, %s312_s20  ;;  %v314_v6 = vld [vmem:[%s408_s2] ss:$0 sm:$0xff]  ;;  %s165_s30 = scalar_lea.vmem %s409_s3, %s312_s20 }
   0xe   : > { %325 = vmatprep.subr.mxu0 %v352_v1  ;;  %v166_v5 = vld [vmem:[%s161_s25] sm:$0xff] }
   0xf   : > { %326 = vmatpush3.msra.mxu0 %v169_v2 }
  0x10   : > { %327 = vmatprep.subr.mxu0 %v352_v1 }
  0x11   : > { %328 = vmatpush3.msra.mxu0 %v168_v3 }
  0x12   : > { %329 = vmatprep.subr.mxu0 %v352_v1 }
  0x13   : > { %330 = vmatpush3.msra.mxu0 %v167_v4 }
  0x14   : > { %332 = vmatmul.mubr.msk.f32.vlgmr.msra.gmra.mxu0 %vm178_vm1, %v166_v5 }
  0xd4   : > { %v248_v7 = vpop.f32.mrf.mxu0 }
  0xd5   : > { %v249_v8 = vadd.f32 %v314_v6, %v248_v7 }
  0xd6   : > { %v333_v9 = vpop.f32.mrf.mxu0 }
  0xd7   : > { %253 = vst.msk [vmem:[%s165_s30] sm:$0xff] %vm252_vm2, %v249_v8 }
  0xd8 PF: > { %s13_s12 = sadd.s32 1, %s350_s12  }
  0xd9   : > { %p10_p4 = scmp.ge.s32.totalorder %s13_s12, 4  }
  0xdb   :  { %12 = sbr.rel (!%p10_p4) target bundleno = 1 (0x1), region = 62 }

</bundles_post_ra>
